<compile_context>
chip_gen: v6e
topology: v6e:2x2x1
jax: 0.10.0
libtpu: 0.0.40
codegen_flags: <defaults>
</compile_context>

<pallas_src>
import math

import jax
import jax.numpy as jnp
from jax.experimental import pallas as pl
from jax.experimental.pallas import tpu as pltpu


def _round_up(x, m):
    return ((x + m - 1) // m) * m


def _maybe_pad(x, target_shape):
    """Zero-pad `x` up to `target_shape`, skipping the copy if already there."""
    pads = tuple((0, t - s) for s, t in zip(x.shape, target_shape))
    if any(hi for _, hi in pads):
        return jnp.pad(x, pads)
    return x


def _choose_tile_m(n, din, dpad, reassoc, budget_bytes):
    """Largest row tile TM (multiple of 8) whose VMEM footprint fits budget."""
    n8 = _round_up(n, 8)
    # Try the full (rounded) row count first: single strip per view is best
    # when it fits (fewest grid steps, no redundant writeback).
    candidates = (n8, 1024, 512, 256, 128, 64, 32, 16, 8)
    for tm in candidates:
        if tm > n8:
            continue
        n_pad = _round_up(n8, tm)
        adj_b = 2 * tm * n_pad * 4            # double-buffered adj row strip
        out_b = 2 * tm * dpad * 4             # double-buffered output strip
        h_b = 2 * n_pad * din * 4             # per-view H (resident)
        w_b = 2 * (din * dpad + dpad) * 4     # W^T + bias
        hw_b = n_pad * dpad * 4 if reassoc else 0   # HW scratch (not dbl-buf)
        if adj_b + out_b + h_b + w_b + hw_b <= budget_bytes:
            return tm
    return 8


def _kernel_reassoc(adj_ref, h_ref, w_ref, b_ref, o_ref, hw_ref):
    # adj_ref: (TM, N_pad)   h_ref: (N_pad, Din)   w_ref: (Din, Dpad)
    # b_ref:   (1, Dpad)     o_ref: (TM, Dpad)     hw_ref: VMEM (N_pad, Dpad)
    @pl.when(pl.program_id(1) == 0)
    def _():
        # HW = H @ W^T, computed once per view on its first row tile.
        hw_ref[...] = jnp.dot(h_ref[...], w_ref[...],
                              preferred_element_type=jnp.float32)

    out = jnp.dot(adj_ref[...], hw_ref[...],
                  preferred_element_type=jnp.float32)
    o_ref[...] = (out + b_ref[...]).astype(o_ref.dtype)


def _kernel_direct(adj_ref, h_ref, w_ref, b_ref, o_ref):
    # Used when in_dim < out_dim: (adj @ H) @ W^T is the cheaper association.
    ah = jnp.dot(adj_ref[...], h_ref[...], preferred_element_type=jnp.float32)
    out = jnp.dot(ah, w_ref[...], preferred_element_type=jnp.float32)
    o_ref[...] = (out + b_ref[...]).astype(o_ref.dtype)


def graphencoder_forward(num_view, gcns_output, adj, weight, bias, *, tile_m=None):
    """Pallas equivalent of Graphencoder.forward.

    Args:
      num_view:     int, number of views (== adj.shape[0]).
      gcns_output:  (num_view, N, in_dim) float32.
      adj:          (num_view, N, N) float32.
      weight:       (out_dim, in_dim) float32 (PyTorch Linear layout).
      bias:         (out_dim,) float32.
      tile_m:       optional row-tile override (multiple of 8).
    Returns:
      (num_view, N, out_dim) float32.
    """
    V, N, Din = gcns_output.shape
    assert V == num_view and adj.shape == (V, N, N)
    Dout, Din_w = weight.shape
    assert Din_w == Din and bias.shape == (Dout,)

    f32 = jnp.float32
    dpad = _round_up(Dout, 128)          # lane-dense output stores
    reassoc = Dout <= Din                # pick cheaper association statically

    budget = 26 * 1024 * 1024
    if tile_m is None:
        tm = _choose_tile_m(N, Din, dpad, reassoc, budget)
    else:
        tm = _round_up(int(tile_m), 8)
    n_pad = _round_up(_round_up(N, 8), tm)
    n_tiles = n_pad // tm

    # Zero-pad: rows/cols of adj and rows of H (padded rows/cols contribute 0),
    # out_dim of W^T / bias (padded columns sliced off at the end).  Pads are
    # skipped when shapes are already aligned (no extra HBM copy).
    adj_p = _maybe_pad(adj.astype(f32), (V, n_pad, n_pad))
    h_p = _maybe_pad(gcns_output.astype(f32), (V, n_pad, Din))
    w_t = _maybe_pad(weight.T.astype(f32), (Din, dpad))
    b2d = _maybe_pad(bias.astype(f32), (dpad,)).reshape(1, dpad)

    in_specs = [
        pl.BlockSpec((pl.Squeezed(), tm, n_pad), lambda v, r: (v, r, 0)),   # adj strip
        pl.BlockSpec((pl.Squeezed(), n_pad, Din), lambda v, r: (v, 0, 0)),  # H[v]
        pl.BlockSpec((Din, dpad), lambda v, r: (0, 0)),                     # W^T shared
        pl.BlockSpec((1, dpad), lambda v, r: (0, 0)),                       # bias shared
    ]
    out_spec = pl.BlockSpec((pl.Squeezed(), tm, dpad), lambda v, r: (v, r, 0))

    if reassoc:
        kernel = _kernel_reassoc
        scratch = [pltpu.VMEM((n_pad, dpad), f32)]
        # HW scratch is carried across the row-tile axis -> keep it sequential
        # ("arbitrary"); views are independent ("parallel" -> megacore shard).
        dim_sem = ("parallel", "arbitrary")
        flops = 2 * V * n_pad * Din * dpad + 2 * V * n_pad * n_pad * dpad
    else:
        kernel = _kernel_direct
        scratch = []
        dim_sem = ("parallel", "parallel")
        flops = 2 * V * n_pad * n_pad * Din + 2 * V * n_pad * Din * dpad

    bytes_accessed = 4 * (adj_p.size + h_p.size + w_t.size + b2d.size
                          + V * n_pad * dpad)
    cost = pl.CostEstimate(flops=flops, transcendentals=0,
                           bytes_accessed=bytes_accessed)

    out_p = pl.pallas_call(
        kernel,
        out_shape=jax.ShapeDtypeStruct((V, n_pad, dpad), f32),
        grid_spec=pltpu.PrefetchScalarGridSpec(
            num_scalar_prefetch=0,
            grid=(V, n_tiles),
            in_specs=in_specs,
            out_specs=out_spec,
            scratch_shapes=scratch,
        ),
        compiler_params=pltpu.CompilerParams(
            dimension_semantics=dim_sem,
            vmem_limit_bytes=32 * 1024 * 1024,
        ),
        cost_estimate=cost,
    )(adj_p, h_p, w_t, b2d)

    return out_p[:, :N, :Dout]


if __name__ == "__main__":
    # Config 1: in_dim == out_dim -> re-associated kernel path; force TM=128
    # so the multi-row-tile + pl.when / HW-scratch path is exercised.
    num_view, N, in_dim, out_dim = 2, 256, 32, 32
    key = jax.random.PRNGKey(0)
    k_adj, k_h, k_w, k_b, k2 = jax.random.split(key, 5)

    adj = jax.random.normal(k_adj, (num_view, N, N), dtype=jnp.float32)
    gcns_output = jax.random.normal(k_h, (num_view, N, in_dim), dtype=jnp.float32)
    bound = 1.0 / math.sqrt(in_dim)
    weight = jax.random.uniform(k_w, (out_dim, in_dim), jnp.float32, -bound, bound)
    bias = jax.random.uniform(k_b, (out_dim,), jnp.float32, -bound, bound)

    out = graphencoder_forward(num_view, gcns_output, adj, weight, bias, tile_m=128)
    out = jax.block_until_ready(out)
    ref = jnp.einsum("vnm,vmd->vnd", adj, gcns_output) @ weight.T + bias
    assert out.shape == (num_view, N, out_dim)
    assert jnp.allclose(out, ref, atol=2e-4, rtol=2e-4), \
        float(jnp.max(jnp.abs(out - ref)))

    # Config 2: in_dim < out_dim -> direct-order kernel; N not a multiple of
    # 8/128 so the zero-padding + single-strip tile-selection path is
    # exercised as well.
    V2, N2, din2, dout2 = 2, 200, 16, 48
    ka, kh, kw, kb = jax.random.split(k2, 4)
    adj2 = jax.random.normal(ka, (V2, N2, N2), dtype=jnp.float32)
    h2 = jax.random.normal(kh, (V2, N2, din2), dtype=jnp.float32)
    bound2 = 1.0 / math.sqrt(din2)
    w2 = jax.random.uniform(kw, (dout2, din2), jnp.float32, -bound2, bound2)
    b2 = jax.random.uniform(kb, (dout2,), jnp.float32, -bound2, bound2)

    out2 = graphencoder_forward(V2, h2, adj2, w2, b2)
    out2 = jax.block_until_ready(out2)
    ref2 = jnp.einsum("vnm,vmd->vnd", adj2, h2) @ w2.T + b2
    assert out2.shape == (V2, N2, dout2)
    assert jnp.allclose(out2, ref2, atol=2e-4, rtol=2e-4), \
        float(jnp.max(jnp.abs(out2 - ref2)))

    print("KERNEL_OK")
</pallas_src>

<mosaic_0001>
module attributes {stable_mosaic.version = 11 : i64} {
  func.func @_kernel_reassoc(%arg0: i32, %arg1: i32, %arg2: memref<1x128x256xf32, #tpu.memory_space<vmem>>, %arg3: memref<1x256x32xf32, #tpu.memory_space<vmem>>, %arg4: memref<32x128xf32, #tpu.memory_space<vmem>>, %arg5: memref<1x128xf32, #tpu.memory_space<vmem>>, %arg6: memref<1x128x128xf32, #tpu.memory_space<vmem>>, %arg7: memref<256x128xf32, #tpu.memory_space<vmem>>) attributes {dimension_semantics = [#tpu.dimension_semantics<parallel>, #tpu.dimension_semantics<arbitrary>], iteration_bounds = array<i64: 2, 2>, scalar_prefetch = 0 : i64, scratch_operands = 1 : i64, tpu.core_type = #tpu.core_type<tc>, window_params = [{transform_indices = @transform_0, window_bounds = array<i64: 1, 128, 256>}, {transform_indices = @transform_1, window_bounds = array<i64: 1, 256, 32>}, {pipeline_mode = #tpu.pipeline_mode<synchronous>, transform_indices = @transform_2, window_bounds = array<i64: 32, 128>}, {pipeline_mode = #tpu.pipeline_mode<synchronous>, transform_indices = @transform_3, window_bounds = array<i64: 1, 128>}, {transform_indices = @transform_4, window_bounds = array<i64: 1, 128, 128>}]} {
    %c0_i32 = arith.constant 0 : i32
    %0 = arith.cmpi eq, %arg1, %c0_i32 : i32
    %1 = arith.extui %0 : i1 to i32
    %c0_i32_0 = arith.constant 0 : i32
    %2 = arith.cmpi ne, %1, %c0_i32_0 : i32
    scf.if %2 {
      %c0_10 = arith.constant 0 : index
      %c0_11 = arith.constant 0 : index
      %c0_12 = arith.constant 0 : index
      %13 = vector.load %arg3[%c0_10, %c0_11, %c0_12] : memref<1x256x32xf32, #tpu.memory_space<vmem>>, vector<1x256x32xf32>
      %14 = vector.shape_cast %13 : vector<1x256x32xf32> to vector<256x32xf32>
      %c0_13 = arith.constant 0 : index
      %c0_14 = arith.constant 0 : index
      %15 = vector.load %arg4[%c0_13, %c0_14] : memref<32x128xf32, #tpu.memory_space<vmem>>, vector<32x128xf32>
      %cst_15 = arith.constant dense<0.000000e+00> : vector<256x128xf32>
      %16 = tpu.matmul %14, %15, %cst_15 {dimension_numbers = #tpu.dot_dimension_numbers<[1], [0], [0], [1], [0, 0, 1, 1], [], []>} : vector<256x32xf32>, vector<32x128xf32>, vector<256x128xf32> -> vector<256x128xf32>
      %c0_16 = arith.constant 0 : index
      %c0_17 = arith.constant 0 : index
      %17 = vector.load %arg7[%c0_16, %c0_17] : memref<256x128xf32, #tpu.memory_space<vmem>>, vector<256x128xf32>
      tpu.vector_store %arg7[%c0_16, %c0_17], %16 {strides = array<i32>} : memref<256x128xf32, #tpu.memory_space<vmem>>, vector<256x128xf32>,
    } else {
    }
    %c0 = arith.constant 0 : index
    %c0_1 = arith.constant 0 : index
    %c0_2 = arith.constant 0 : index
    %3 = vector.load %arg2[%c0, %c0_1, %c0_2] : memref<1x128x256xf32, #tpu.memory_space<vmem>>, vector<1x128x256xf32>
    %4 = vector.shape_cast %3 : vector<1x128x256xf32> to vector<128x256xf32>
    %c0_3 = arith.constant 0 : index
    %c0_4 = arith.constant 0 : index
    %5 = vector.load %arg7[%c0_3, %c0_4] : memref<256x128xf32, #tpu.memory_space<vmem>>, vector<256x128xf32>
    %cst = arith.constant dense<0.000000e+00> : vector<128x128xf32>
    %6 = tpu.matmul %4, %5, %cst {dimension_numbers = #tpu.dot_dimension_numbers<[1], [0], [0], [1], [0, 0, 1, 1], [], []>} : vector<128x256xf32>, vector<256x128xf32>, vector<128x128xf32> -> vector<128x128xf32>
    %c0_5 = arith.constant 0 : index
    %c0_6 = arith.constant 0 : index
    %7 = vector.load %arg5[%c0_5, %c0_6] : memref<1x128xf32, #tpu.memory_space<vmem>>, vector<1x128xf32>
    %8 = vector.broadcast %7 : vector<1x128xf32> to vector<128x128xf32>
    %9 = arith.addf %6, %8 : vector<128x128xf32>
    %c0_7 = arith.constant 0 : index
    %c0_8 = arith.constant 0 : index
    %c0_9 = arith.constant 0 : index
    %10 = vector.load %arg6[%c0_7, %c0_8, %c0_9] : memref<1x128x128xf32, #tpu.memory_space<vmem>>, vector<1x128x128xf32>
    %11 = vector.shape_cast %10 : vector<1x128x128xf32> to vector<128x128xf32>
    %12 = vector.shape_cast %9 : vector<128x128xf32> to vector<1x128x128xf32>
    tpu.vector_store %arg6[%c0_7, %c0_8, %c0_9], %12 {strides = array<i32>} : memref<1x128x128xf32, #tpu.memory_space<vmem>>, vector<1x128x128xf32>,
    return
  }
  func.func @transform_0(%arg0: i32, %arg1: i32) -> (i32, i32, i32) {
    %c0_i32 = arith.constant 0 : i32
    %c0_i32_0 = arith.constant 0 : i32
    return %arg0, %arg1, %c0_i32 : i32, i32, i32
  }
  func.func @transform_1(%arg0: i32, %arg1: i32) -> (i32, i32, i32) {
    %c0_i32 = arith.constant 0 : i32
    %c0_i32_0 = arith.constant 0 : i32
    %c0_i32_1 = arith.constant 0 : i32
    return %arg0, %c0_i32, %c0_i32_0 : i32, i32, i32
  }
  func.func @transform_2(%arg0: i32, %arg1: i32) -> (i32, i32) {
    %c0_i32 = arith.constant 0 : i32
    %c0_i32_0 = arith.constant 0 : i32
    %c0_i32_1 = arith.constant 0 : i32
    return %c0_i32, %c0_i32_0 : i32, i32
  }
  func.func @transform_3(%arg0: i32, %arg1: i32) -> (i32, i32) {
    %c0_i32 = arith.constant 0 : i32
    %c0_i32_0 = arith.constant 0 : i32
    %c0_i32_1 = arith.constant 0 : i32
    return %c0_i32, %c0_i32_0 : i32, i32
  }
  func.func @transform_4(%arg0: i32, %arg1: i32) -> (i32, i32, i32) {
    %c0_i32 = arith.constant 0 : i32
    %c0_i32_0 = arith.constant 0 : i32
    return %arg0, %arg1, %c0_i32 : i32, i32, i32
  }
}

</mosaic_0001>

<bundles_post_ra>
// kernel: tpu_custom_call.1
= control target key start
LH: loop header
LB: loop body
LE: loop exit
PB: predicated region body
PF: predicated region fallthrough
CT: control target
= control target key end

     0   :  { %9 = vsyncpa [#allocation4], 0  ;;  %s1833_s0 = inlined_call_operand.hbm [shape: f32[2,256,256], index: 0, kind: input, shape index: {}]   ;;  %s1834_s1 = inlined_call_operand.vmem [shape: f32[2,256,32], index: 1, kind: input, shape index: {}]   ;;  %s1835_s2 = inlined_call_operand.vmem [shape: f32[32,128], index: 2, kind: input, shape index: {}]   ;;  %s1836_s3 = inlined_call_operand.vmem [shape: f32[1,128], index: 3, kind: input, shape index: {}]   ;;  %s1837_s4 = inlined_call_operand.hbm [shape: f32[2,256,128], index: 4, kind: output, shape index: {}]  }
   0x1   :  { %11 = vsyncpa [#allocation4 + $0x1], 0 }
   0x2   :  { %12 = vsyncpa [#allocation5], 0 }
   0x3   :  { %14 = vsyncpa [#allocation5 + $0x1], 0  ;;  %s1508_s15 = smov 0   ;;  %s1510_s16 = smov 0  }
   0x4   :  { %s1512_s17 = smov 0   ;;  %s1514_s18 = smov 0  }
   0x5   :  { %s1516_s19 = smov 0   ;;  %s1518_s20 = smov 0  }
   0x6   :  { %s1520_s21 = smov 0   ;;  %s1522_s22 = smov 0  }
   0x7 LB: > { %1841 = sst [smem:[#allocation9_spill]] %s1467_s20  ;;  %s1001_s23 = sadd.s32 4294967295, %s1475_s22   ;;  %s1475_s22 = sphi %s1522_s22, %s20_s22   ;;  %s1471_s21 = sphi %s1520_s21, %s1856_s21   ;;  %s1467_s20 = sphi %s1518_s20, %s1850_s20   ;;  %s1463_s19 = sphi %s1516_s19, %s1855_s19   ;;  %s1459_s18 = sphi %s1514_s18, %s1849_s18   ;;  %s1455_s17 = sphi %s1512_s17, %s1854_s17   ;;  %s1451_s16 = sphi %s1510_s16, %s1853_s16   ;;  %s1447_s15 = sphi %s1508_s15, %s1852_s15  }
   0x8   : > { %s1002_s24 = sadd.s32 4294967294, %s1475_s22   ;;  %s29_s25 = sadd.s32 1, %s1467_s20 }
   0x9   : > { %s32_s26 = sadd.s32 1, %s1471_s21  ;;  %p30_p0 = scmp.ge.s32.totalorder %s29_s25, 2 }
   0xa   : > { %s41_s27 = sadd.s32 1, %s1455_s17  ;;  %p48_p1 = scmp.ne.s32.totalorder %s1455_s17, %s1451_s16 }
   0xb   : > { %p49_p2 = scmp.eq.s32.totalorder %s1475_s22, 0  ;;  %s1858_s25 = smov (%p30_p0, %s29_s25), 0 }
   0xc   : > { %1842 = sst [smem:[#allocation10_spill]] %s1858_s25  ;;  %s1860_s26 = smov (!%p30_p0, %s32_s26), %s1471_s21 }
   0xd   : > { %s37_s28 = ssub.s32 %s1467_s20, %s1858_s25  ;;  %p1561_p3 = por %p49_p2, %p48_p1 }
   0xe   : > { %p34_p4 = scmp.ge.s32.totalorder %s1860_s26, 2  ;;  %p54_p5 = scmp.ne.s32.totalorder %s1451_s16, %s1447_s15 }
   0xf   : > { %p55_p6 = scmp.eq.s32.totalorder %s1001_s23, 0  ;;  %p148_p7 = scmp.eq.s32.totalorder %s1001_s23, 3 }
  0x10   : > { %s1862_s26 = smov (%p34_p4, %s1860_s26), 0  ;;  %p154_p10 = scmp.eq.s32.totalorder %s1002_s24, 3 }
  0x11   : > { %1844 = sst [smem:[#allocation11_spill]] %s1862_s26  ;;  %p1569_p8 = por %p55_p6, %p54_p5 }
  0x12   : > { %p1573_p9 = por %p148_p7, %p48_p1  ;;  %s36_s6 = ssub.s32 %s1471_s21, %s1862_s26 }
  0x13   : > { %s38_s7 = sor.u32 %s37_s28, %s36_s6  ;;  %p1579_p12 = por %p154_p10, %p54_p5 }
  0x14   : > { %p39_p11 = scmp.eq.s32.totalorder %s38_s7, 0  ;;  %p1281_p13 = scmp.lt.s32.totalorder %s1475_s22, 4 }
  0x15   : > { %s180_s9 = sand.u32 1, %s1455_s17   ;;  %s1055_s12 = sshll.u32 %s1467_s20, 5 }
  0x16   : > { %s1586_s10 = scalar_select %p39_p11, %s1455_s17, %s41_s27  }
  0x17   : > { %s1005_s11 = sshll.u32 %s180_s9, 8  ;;  %s1008_s13 = sshll.u32 %s1471_s21, 6 }
  0x18   : > { %s184_s14 = scalar_lea.vmem [#allocation3], %s1005_s11  ;;  %s191_s25 = sadd.s32 %s1055_s12, %s1008_s13 }
  0x19   : > { %s194_s23 = sshll.u32 %s184_s14, 4  ;;  %s1009_s26 = sshll.u32 %s191_s25, 7  ;;  %s195_s23 = int_to_ptr.vmem [resolvable:$true] %s194_s23 }
  0x1a   : > { %p1592_p0 = pnand %p1281_p13, %p1561_p3  ;;  %s193_s7 = scalar_lea.hbm %s1833_s0, %s1009_s26 }
  0x1b   : > { %s181_s27 = scalar_lea.sflag [#allocation4], %s180_s9  ;;  %s1364_s20 = scalar_lea.vmem %s195_s23, 4096 }
  0x1c   : > { %p1353_p1 = pneg %p1592_p0  ;;  %p1365_p2 = scmp.ne.s32.totalorder %s195_s23, %s1364_s20 }
  0x1d   : > { %s1477_s11 = smov [#allocation3]  }
  0x1e   : > { %p1367_p4 = pnand %p1365_p2, %p1353_p1  ;;  %s1369_s12 = sshll.u32 %s1477_s11, 4  ;;  %s1370_s12 = int_to_ptr.vmem [resolvable:$false] %s1369_s12 }
  0x1f   : > { %s1371_s25 = scalar_lea.vmem %s1370_s12, 8192  ;;  %p1372_p3 = scmp.lt.s32.totalorder %s195_s23, %s1370_s12 }
  0x20   : > { %p1368_p5 = pneg %p1367_p4  ;;  %p1373_p6 = scmp.lt.s32.totalorder %s1371_s25, %s1364_s20 }
  0x22   : > { %p1374_p7 = por %p1373_p6, %p1372_p3 }
  0x24   : > { %p1375_p10 = pnand %p1374_p7, %p1368_p5 }
  0x26   : > { %1378 = shalt.err (!%p1375_p10)
}
  0x27   : > { %s1478_s29 = smov 256   ;;  %s1479_s26 = smov 16  }
  0x28   : > { %1276 = dma.hbm_to_vmem [thread:$0]  (!%p1592_p0), %s193_s7, 4096, %s195_s23, %s181_s27, %s1478_s29, %s1478_s29, %s1479_s26  }
  0x29   : > { %p1010_p11 = scmp.ge.s32.totalorder %s1475_s22, 1  ;;  %p210_p13 = scmp.lt.s32.totalorder %s1475_s22, 5 }
  0x2b   : > { %p211_p1 = pnand %p1010_p11, %p210_p13 }
  0x2c   : > { %s1606_s9 = sand.u32 (!%p211_p1), 1, %s1451_s16  }
  0x2d   : > { %214 = sbr.rel (%p211_p1) target bundleno = 572 (0x23c), region = 36  ;;  %s1011_s20 = sshll.u32 (!%p211_p1), %s1606_s9, 8 }
  0x2e   : > { %s217_s13 = scalar_lea.sflag (!%p211_p1), [#allocation4], %s1606_s9  ;;  %s1610_s14 = scalar_lea.vmem (!%p211_p1), [#allocation3], %s1011_s20 }
  0x32   : > { %1438 = dma.done.wait (%p1569_p8), %s217_s13, 4096  }
  0x33   : > { %1440 = vsyncadd (%p1569_p8), %s217_s13, 4294963200  ;;  %s1012_s23 = sshll.u32 %s1606_s9, 7  ;;  %p251_p0 = scmp.lt.s32.totalorder %s1463_s19, 1 }
  0x34   : > { %s1624_s11 = scalar_lea.vmem [#allocation6], %s1012_s23  ;;  %p1015_p2 = scmp.ne.s32.totalorder %s1459_s18, 0 }
  0x35   : > { %s252_s24 = scalar_select %p251_p0, %s1463_s19, 1 }
  0x36   : > { %260 = sbr.rel (%p1015_p2) target bundleno = 293 (0x125), region = 44 }
  0x37   : > { %s1056_s28 = sshll.u32 %s252_s24, 8 }
  0x38   : > { %s1622_s27 = scalar_lea.vmem %s1834_s1, %s1056_s28 }
  0x3b   : > { %v296_v0 = vld [vmem:[%s1835_s2 + $0x18] sm:$0xff]  ;;  %v295_v1 = vld [vmem:[%s1835_s2 + $0x10] sm:$0xff]  ;;  %v294_v2 = vld [vmem:[%s1835_s2 + $0x8] sm:$0xff]  ;;  %vm297_vm0 = vcmask 261120  }
  0x3c   : > { %1173 = vmatprep.subr.mxu0 %v296_v0  ;;  %1229 = vmatprep.subr.mxu1 %v296_v0  ;;  %v293_v3 = vld [vmem:[%s1835_s2] sm:$0xff]  ;;  %v262_v6 = vld [vmem:[%s1622_s27 + $0x8] sm:$0xff]  ;;  %v263_v8 = vld [vmem:[%s1622_s27 + $0x10] sm:$0xff] }
  0x3d   : > { %1174 = vmatpush3.msra.mxu0 %v296_v0  ;;  %1233 = vmatpush3.msra.mxu1 %v296_v0  ;;  %v261_v4 = vld [vmem:[%s1622_s27] sm:$0xff]  ;;  %v278_v7 = vld [vmem:[%s1622_s27 + $0x88] sm:$0xff]  ;;  %v279_v9 = vld [vmem:[%s1622_s27 + $0x90] sm:$0xff] }
  0x3e   : > { %1175 = vmatprep.subr.mxu0 %v295_v1  ;;  %1230 = vmatprep.subr.mxu1 %v295_v1  ;;  %v277_v5 = vld [vmem:[%s1622_s27 + $0x80] sm:$0xff]  ;;  %v264_v10 = vld [vmem:[%s1622_s27 + $0x18] sm:$0xff]  ;;  %v266_v14 = vld [vmem:[%s1622_s27 + $0x28] sm:$0xff] }
  0x3f   : > { %1176 = vmatpush3.msra.mxu0 %v295_v1  ;;  %1234 = vmatpush3.msra.mxu1 %v295_v1  ;;  %v280_v11 = vld [vmem:[%s1622_s27 + $0x98] sm:$0xff]  ;;  %v265_v12 = vld [vmem:[%s1622_s27 + $0x20] sm:$0xff]  ;;  %v282_v15 = vld [vmem:[%s1622_s27 + $0xa8] sm:$0xff] }
  0x40   : > { %1177 = vmatprep.subr.mxu0 %v294_v2  ;;  %1231 = vmatprep.subr.mxu1 %v294_v2  ;;  %v281_v13 = vld [vmem:[%s1622_s27 + $0xa0] sm:$0xff]  ;;  %v267_v16 = vld [vmem:[%s1622_s27 + $0x30] sm:$0xff]  ;;  %v268_v18 = vld [vmem:[%s1622_s27 + $0x38] sm:$0xff] }
  0x41   : > { %1178 = vmatpush3.msra.mxu0 %v294_v2  ;;  %1235 = vmatpush3.msra.mxu1 %v294_v2  ;;  %v283_v17 = vld [vmem:[%s1622_s27 + $0xb0] sm:$0xff]  ;;  %v284_v19 = vld [vmem:[%s1622_s27 + $0xb8] sm:$0xff]  ;;  %v269_v20 = vld [vmem:[%s1622_s27 + $0x40] sm:$0xff] }
  0x42   : > { %1179 = vmatprep.subr.mxu0 %v293_v3  ;;  %1232 = vmatprep.subr.mxu1 %v293_v3  ;;  %v285_v21 = vld [vmem:[%s1622_s27 + $0xc0] sm:$0xff]  ;;  %v270_v22 = vld [vmem:[%s1622_s27 + $0x48] sm:$0xff]  ;;  %v271_v24 = vld [vmem:[%s1622_s27 + $0x50] sm:$0xff] }
  0x43   : > { %1180 = vmatpush3.msra.mxu0 %v293_v3  ;;  %1236 = vmatpush3.msra.mxu1 %v293_v3  ;;  %v286_v23 = vld [vmem:[%s1622_s27 + $0xc8] sm:$0xff]  ;;  %v287_v25 = vld [vmem:[%s1622_s27 + $0xd0] sm:$0xff]  ;;  %v272_v26 = vld [vmem:[%s1622_s27 + $0x58] sm:$0xff] }
  0x44   : > { %1181 = vmatprep.mubr.msk.f32.mxu0 %vm297_vm0, %v261_v4  ;;  %1205 = vmatprep.mubr.msk.f32.mxu1 %vm297_vm0, %v277_v5  ;;  %v288_v27 = vld [vmem:[%s1622_s27 + $0xd8] sm:$0xff]  ;;  %v273_v28 = vld [vmem:[%s1622_s27 + $0x60] sm:$0xff]  ;;  %v274_v30 = vld [vmem:[%s1622_s27 + $0x68] sm:$0xff] }
  0x45   : > { %1182 = vmatmul.mubr.msk.f32.vlgmr.msra.gmra.mxu0 %vm297_vm0, %v262_v6  ;;  %1206 = vmatmul.mubr.msk.f32.vlgmr.msra.gmra.mxu1 %vm297_vm0, %v278_v7  ;;  %v289_v29 = vld [vmem:[%s1622_s27 + $0xe0] sm:$0xff]  ;;  %v290_v31 = vld [vmem:[%s1622_s27 + $0xe8] sm:$0xff]  ;;  %v275_v32 = vld [vmem:[%s1622_s27 + $0x70] sm:$0xff] }
  0x46   : > { %1184 = vmatprep.mubr.msk.f32.mxu0 %vm297_vm0, %v263_v8  ;;  %1208 = vmatprep.mubr.msk.f32.mxu1 %vm297_vm0, %v279_v9  ;;  %v291_v33 = vld [vmem:[%s1622_s27 + $0xf0] sm:$0xff]  ;;  %v276_v34 = vld [vmem:[%s1622_s27 + $0x78] sm:$0xff] }
  0x47   : > { %v292_v35 = vld [vmem:[%s1622_s27 + $0xf8] sm:$0xff] }
  0x49   : > { %1185 = vmatmul.mubr.msk.f32.gmra.mxu0 %vm297_vm0, %v264_v10  ;;  %1209 = vmatmul.mubr.msk.f32.gmra.mxu1 %vm297_vm0, %v280_v11 }
  0x4a   : > { %1187 = vmatprep.mubr.msk.f32.mxu0 %vm297_vm0, %v265_v12  ;;  %1211 = vmatprep.mubr.msk.f32.mxu1 %vm297_vm0, %v281_v13 }
  0x4d   : > { %1188 = vmatmul.mubr.msk.f32.gmra.mxu0 %vm297_vm0, %v266_v14  ;;  %1212 = vmatmul.mubr.msk.f32.gmra.mxu1 %vm297_vm0, %v282_v15 }
  0x4e   : > { %1190 = vmatprep.mubr.msk.f32.mxu0 %vm297_vm0, %v267_v16  ;;  %1214 = vmatprep.mubr.msk.f32.mxu1 %vm297_vm0, %v283_v17 }
  0x51   : > { %1191 = vmatmul.mubr.msk.f32.gmra.mxu0 %vm297_vm0, %v268_v18  ;;  %1215 = vmatmul.mubr.msk.f32.gmra.mxu1 %vm297_vm0, %v284_v19 }
  0x52   : > { %1193 = vmatprep.mubr.msk.f32.mxu0 %vm297_vm0, %v269_v20  ;;  %1217 = vmatprep.mubr.msk.f32.mxu1 %vm297_vm0, %v285_v21 }
  0x55   : > { %1194 = vmatmul.mubr.msk.f32.gmra.mxu0 %vm297_vm0, %v270_v22  ;;  %1218 = vmatmul.mubr.msk.f32.gmra.mxu1 %vm297_vm0, %v286_v23 }
  0x56   : > { %1196 = vmatprep.mubr.msk.f32.mxu0 %vm297_vm0, %v271_v24  ;;  %1220 = vmatprep.mubr.msk.f32.mxu1 %vm297_vm0, %v287_v25 }
  0x59   : > { %1197 = vmatmul.mubr.msk.f32.gmra.mxu0 %vm297_vm0, %v272_v26  ;;  %1221 = vmatmul.mubr.msk.f32.gmra.mxu1 %vm297_vm0, %v288_v27 }
  0x5a   : > { %1199 = vmatprep.mubr.msk.f32.mxu0 %vm297_vm0, %v273_v28  ;;  %1223 = vmatprep.mubr.msk.f32.mxu1 %vm297_vm0, %v289_v29 }
  0x5d   : > { %1200 = vmatmul.mubr.msk.f32.gmra.mxu0 %vm297_vm0, %v274_v30  ;;  %1224 = vmatmul.mubr.msk.f32.gmra.mxu1 %vm297_vm0, %v290_v31 }
  0x5e   : > { %1202 = vmatprep.mubr.msk.f32.mxu0 %vm297_vm0, %v275_v32  ;;  %1226 = vmatprep.mubr.msk.f32.mxu1 %vm297_vm0, %v291_v33 }
  0x61   : > { %1203 = vmatmul.mubr.msk.f32.gmra.mxu0 %vm297_vm0, %v276_v34  ;;  %1227 = vmatmul.mubr.msk.f32.gmra.mxu1 %vm297_vm0, %v292_v35 }
 0x105   : > { %v1183_v36 = vpop.f32.mrf.mxu0  ;;  %v1207_v37 = vpop.f32.mrf.mxu1 }
 0x106   : > { %620 = vst [vmem:[#allocation2] sm:$0xff] %v1183_v36  ;;  %636 = vst [vmem:[#allocation2 + $0x58] sm:$0xff] %v1207_v37 }
 0x107   : > { %v460_v38 = vpop.f32.mrf.mxu0  ;;  %v540_v39 = vpop.f32.mrf.mxu1 }
 0x108   : > { %619 = vst [vmem:[#allocation2 + $0xb0] sm:$0xff] %v460_v38  ;;  %635 = vst [vmem:[#allocation2 + $0x38] sm:$0xff] %v540_v39 }
 0x109   : > { %v1186_v40 = vpop.f32.mrf.mxu0  ;;  %v1210_v41 = vpop.f32.mrf.mxu1 }
 0x10a   : > { %622 = vst [vmem:[#allocation2 + $0x18] sm:$0xff] %v1186_v40  ;;  %638 = vst [vmem:[#allocation2 + $0xc8] sm:$0xff] %v1210_v41 }
 0x10b   : > { %v470_v42 = vpop.f32.mrf.mxu0  ;;  %v550_v43 = vpop.f32.mrf.mxu1 }
 0x10c   : > { %621 = vst [vmem:[#allocation2 + $0xd8] sm:$0xff] %v470_v42  ;;  %637 = vst [vmem:[#allocation2 + $0x40] sm:$0xff] %v550_v43 }
 0x10d   : > { %v1189_v44 = vpop.f32.mrf.mxu0  ;;  %v1213_v45 = vpop.f32.mrf.mxu1 }
 0x10e   : > { %624 = vst [vmem:[#allocation2 + $0x68] sm:$0xff] %v1189_v44  ;;  %640 = vst [vmem:[#allocation2 + $0x90] sm:$0xff] %v1213_v45 }
 0x10f   : > { %v480_v46 = vpop.f32.mrf.mxu0  ;;  %v560_v47 = vpop.f32.mrf.mxu1 }
 0x110   : > { %623 = vst [vmem:[#allocation2 + $0x50] sm:$0xff] %v480_v46  ;;  %639 = vst [vmem:[#allocation2 + $0xe0] sm:$0xff] %v560_v47 }
 0x111   : > { %v1192_v48 = vpop.f32.mrf.mxu0  ;;  %v1216_v49 = vpop.f32.mrf.mxu1 }
 0x112   : > { %626 = vst [vmem:[#allocation2 + $0x48] sm:$0xff] %v1192_v48  ;;  %642 = vst [vmem:[#allocation2 + $0xc0] sm:$0xff] %v1216_v49 }
 0x113   : > { %v490_v50 = vpop.f32.mrf.mxu0  ;;  %v570_v51 = vpop.f32.mrf.mxu1 }
 0x114   : > { %625 = vst [vmem:[#allocation2 + $0x30] sm:$0xff] %v490_v50  ;;  %641 = vst [vmem:[#allocation2 + $0x70] sm:$0xff] %v570_v51 }
 0x115   : > { %v1195_v52 = vpop.f32.mrf.mxu0  ;;  %v1219_v53 = vpop.f32.mrf.mxu1 }
 0x116   : > { %628 = vst [vmem:[#allocation2 + $0x88] sm:$0xff] %v1195_v52  ;;  %644 = vst [vmem:[#allocation2 + $0xd0] sm:$0xff] %v1219_v53 }
 0x117   : > { %v500_v54 = vpop.f32.mrf.mxu0  ;;  %v580_v55 = vpop.f32.mrf.mxu1 }
 0x118   : > { %627 = vst [vmem:[#allocation2 + $0x80] sm:$0xff] %v500_v54  ;;  %643 = vst [vmem:[#allocation2 + $0xa8] sm:$0xff] %v580_v55 }
 0x119   : > { %v1198_v56 = vpop.f32.mrf.mxu0  ;;  %v1222_v57 = vpop.f32.mrf.mxu1 }
 0x11a   : > { %630 = vst [vmem:[#allocation2 + $0xb8] sm:$0xff] %v1198_v56  ;;  %646 = vst [vmem:[#allocation2 + $0x28] sm:$0xff] %v1222_v57 }
 0x11b   : > { %v510_v58 = vpop.f32.mrf.mxu0  ;;  %v590_v59 = vpop.f32.mrf.mxu1 }
 0x11c   : > { %629 = vst [vmem:[#allocation2 + $0xe8] sm:$0xff] %v510_v58  ;;  %645 = vst [vmem:[#allocation2 + $0x10] sm:$0xff] %v590_v59 }
 0x11d   : > { %v1201_v60 = vpop.f32.mrf.mxu0  ;;  %v1225_v61 = vpop.f32.mrf.mxu1 }
 0x11e   : > { %632 = vst [vmem:[#allocation2 + $0xf0] sm:$0xff] %v1201_v60  ;;  %648 = vst [vmem:[#allocation2 + $0xf8] sm:$0xff] %v1225_v61 }
 0x11f   : > { %v520_v62 = vpop.f32.mrf.mxu0  ;;  %v600_v63 = vpop.f32.mrf.mxu1 }
 0x120   : > { %631 = vst [vmem:[#allocation2 + $0x60] sm:$0xff] %v520_v62  ;;  %647 = vst [vmem:[#allocation2 + $0xa0] sm:$0xff] %v600_v63 }
 0x121   : > { %v1204_v0 = vpop.f32.mrf.mxu0  ;;  %v1228_v1 = vpop.f32.mrf.mxu1 }
 0x122   : > { %634 = vst [vmem:[#allocation2 + $0x78] sm:$0xff] %v1204_v0  ;;  %650 = vst [vmem:[#allocation2 + $0x98] sm:$0xff] %v1228_v1 }
 0x123   : > { %v530_v2 = vpop.f32.mrf.mxu0  ;;  %v610_v3 = vpop.f32.mrf.mxu1 }
 0x124   : > { %633 = vst [vmem:[#allocation2 + $0x8] sm:$0xff] %v530_v2  ;;  %649 = vst [vmem:[#allocation2 + $0x20] sm:$0xff] %v610_v3 }
 0x125 PF: > { %v712_v8 = vld [vmem:[#allocation2 + $0xf8] sm:$0xff]  ;;  %v696_v9 = vld [vmem:[#allocation2 + $0xf0] sm:$0xff]  ;;  %v710_v12 = vld [vmem:[#allocation2 + $0x28] sm:$0xff]  ;;  %s1051_s6 = sshll.u32 %s1463_s19, 5  ;;  %s899_s19 = sshll.u32 %s1624_s11, 4  ;;  %s1776_s19 = int_to_ptr.vmem [resolvable:$true] %s899_s19 }
 0x126   : > { %v694_v13 = vld [vmem:[#allocation2 + $0xb8] sm:$0xff]  ;;  %v709_v14 = vld [vmem:[#allocation2 + $0x10] sm:$0xff]  ;;  %v693_v15 = vld [vmem:[#allocation2 + $0xe8] sm:$0xff]  ;;  %s884_s25 = scalar_lea.sflag [#allocation5], %s1606_s9  ;;  %s1379_s29 = scalar_lea.vmem %s1776_s19, 2048 }
 0x127   : > { %v711_v10 = vld [vmem:[#allocation2 + $0xa0] sm:$0xff]  ;;  %v708_v16 = vld [vmem:[#allocation2 + $0xd0] sm:$0xff]  ;;  %v692_v17 = vld [vmem:[#allocation2 + $0x88] sm:$0xff]  ;;  %p1380_p8 = scmp.ne.s32.totalorder %s1776_s19, %s1379_s29  ;;  %s1480_s26 = smov [#allocation6]  }
 0x128   : > { %v695_v11 = vld [vmem:[#allocation2 + $0x60] sm:$0xff]  ;;  %v707_v18 = vld [vmem:[#allocation2 + $0xa8] sm:$0xff]  ;;  %v705_v22 = vld [vmem:[#allocation2 + $0x70] sm:$0xff]  ;;  %s1383_s20 = sshll.u32 %s1480_s26, 4  ;;  %s1384_s20 = int_to_ptr.vmem [resolvable:$false] %s1383_s20 }
 0x129   : > { %v714_v4 = vld [vmem:[#allocation2 + $0x98] sm:$0xff]  ;;  %v691_v19 = vld [vmem:[#allocation2 + $0x80] sm:$0xff]  ;;  %v690_v21 = vld [vmem:[#allocation2 + $0x48] sm:$0xff]  ;;  %p1381_p4 = pnand %p1380_p8, %p1573_p9  ;;  %s1385_s13 = scalar_lea.vmem %s1384_s20, 4096 }
 0x12a   : > { %v698_v5 = vld [vmem:[#allocation2 + $0x78] sm:$0xff]  ;;  %1093 = vmatprep.subr.mxu0 %v714_v4  ;;  %1237 = vmatprep.subr.mxu1 %v714_v4  ;;  %v706_v20 = vld [vmem:[#allocation2 + $0xc0] sm:$0xff]  ;;  %v689_v23 = vld [vmem:[#allocation2 + $0x30] sm:$0xff]  ;;  %p1386_p3 = scmp.lt.s32.totalorder %s1776_s19, %s1384_s20  ;;  %p1387_p6 = scmp.lt.s32.totalorder %s1385_s13, %s1379_s29 }
 0x12b   : > { %v713_v6 = vld [vmem:[#allocation2 + $0x20] sm:$0xff]  ;;  %v697_v7 = vld [vmem:[#allocation2 + $0x8] sm:$0xff]  ;;  %1094 = vmatpush3.msra.mxu0 %v698_v5  ;;  %1253 = vmatpush3.msra.mxu1 %v698_v5  ;;  %v704_v24 = vld [vmem:[#allocation2 + $0x90] sm:$0xff]  ;;  %p1382_p5 = pneg %p1381_p4 }
 0x12c   : > { %1095 = vmatprep.subr.mxu0 %v713_v6  ;;  %1238 = vmatprep.subr.mxu1 %v713_v6  ;;  %v688_v25 = vld [vmem:[#allocation2 + $0x68] sm:$0xff]  ;;  %v703_v26 = vld [vmem:[#allocation2 + $0xe0] sm:$0xff]  ;;  %v687_v27 = vld [vmem:[#allocation2 + $0x50] sm:$0xff]  ;;  %p1388_p7 = por %p1387_p6, %p1386_p3 }
 0x12d   : > { %1096 = vmatpush3.msra.mxu0 %v697_v7  ;;  %1254 = vmatpush3.msra.mxu1 %v697_v7  ;;  %v702_v28 = vld [vmem:[#allocation2 + $0xc8] sm:$0xff]  ;;  %v686_v29 = vld [vmem:[#allocation2 + $0x18] sm:$0xff]  ;;  %v701_v30 = vld [vmem:[#allocation2 + $0x40] sm:$0xff] }
 0x12e   : > { %1097 = vmatprep.subr.mxu0 %v712_v8  ;;  %1239 = vmatprep.subr.mxu1 %v712_v8  ;;  %v685_v31 = vld [vmem:[#allocation2 + $0xd8] sm:$0xff]  ;;  %v684_v33 = vld [vmem:[#allocation2] sm:$0xff]  ;;  %v683_v35 = vld [vmem:[#allocation2 + $0xb0] sm:$0xff]  ;;  %p1389_p10 = pnand %p1388_p7, %p1382_p5 }
 0x12f   : > { %1098 = vmatpush3.msra.mxu0 %v696_v9  ;;  %1255 = vmatpush3.msra.mxu1 %v696_v9  ;;  %v700_v32 = vld [vmem:[#allocation2 + $0x58] sm:$0xff]  ;;  %v652_v36 = vld [vmem:[%s1610_s14 + $0x8] sm:$0xff]  ;;  %v651_v38 = vld [vmem:[%s1610_s14] sm:$0xff] }
 0x130   : > { %1099 = vmatprep.subr.mxu0 %v711_v10  ;;  %1240 = vmatprep.subr.mxu1 %v711_v10  ;;  %v699_v34 = vld [vmem:[#allocation2 + $0x38] sm:$0xff]  ;;  %v668_v37 = vld [vmem:[%s1610_s14 + $0x88] sm:$0xff]  ;;  %v667_v39 = vld [vmem:[%s1610_s14 + $0x80] sm:$0xff] }
 0x131   : > { %1100 = vmatpush3.msra.mxu0 %v695_v11  ;;  %1256 = vmatpush3.msra.mxu1 %v695_v11  ;;  %v654_v40 = vld [vmem:[%s1610_s14 + $0x18] sm:$0xff]  ;;  %v653_v42 = vld [vmem:[%s1610_s14 + $0x10] sm:$0xff]  ;;  %v656_v44 = vld [vmem:[%s1610_s14 + $0x28] sm:$0xff] }
 0x132   : > { %1101 = vmatprep.subr.mxu0 %v710_v12  ;;  %1241 = vmatprep.subr.mxu1 %v710_v12  ;;  %v670_v41 = vld [vmem:[%s1610_s14 + $0x98] sm:$0xff]  ;;  %v669_v43 = vld [vmem:[%s1610_s14 + $0x90] sm:$0xff]  ;;  %v672_v45 = vld [vmem:[%s1610_s14 + $0xa8] sm:$0xff] }
 0x133   : > { %1102 = vmatpush3.msra.mxu0 %v694_v13  ;;  %1257 = vmatpush3.msra.mxu1 %v694_v13  ;;  %v655_v46 = vld [vmem:[%s1610_s14 + $0x20] sm:$0xff]  ;;  %v658_v48 = vld [vmem:[%s1610_s14 + $0x38] sm:$0xff]  ;;  %v657_v50 = vld [vmem:[%s1610_s14 + $0x30] sm:$0xff] }
 0x134   : > { %1103 = vmatprep.subr.mxu0 %v709_v14  ;;  %1242 = vmatprep.subr.mxu1 %v709_v14  ;;  %v671_v47 = vld [vmem:[%s1610_s14 + $0xa0] sm:$0xff]  ;;  %v674_v49 = vld [vmem:[%s1610_s14 + $0xb8] sm:$0xff]  ;;  %v673_v51 = vld [vmem:[%s1610_s14 + $0xb0] sm:$0xff] }
 0x135   : > { %1104 = vmatpush3.msra.mxu0 %v693_v15  ;;  %1258 = vmatpush3.msra.mxu1 %v693_v15  ;;  %v660_v52 = vld [vmem:[%s1610_s14 + $0x48] sm:$0xff]  ;;  %v659_v54 = vld [vmem:[%s1610_s14 + $0x40] sm:$0xff]  ;;  %v662_v56 = vld [vmem:[%s1610_s14 + $0x58] sm:$0xff] }
 0x136   : > { %1105 = vmatprep.subr.mxu0 %v708_v16  ;;  %1243 = vmatprep.subr.mxu1 %v708_v16  ;;  %v676_v53 = vld [vmem:[%s1610_s14 + $0xc8] sm:$0xff]  ;;  %v675_v55 = vld [vmem:[%s1610_s14 + $0xc0] sm:$0xff]  ;;  %v678_v57 = vld [vmem:[%s1610_s14 + $0xd8] sm:$0xff] }
 0x137   : > { %1106 = vmatpush3.msra.mxu0 %v692_v17  ;;  %1259 = vmatpush3.msra.mxu1 %v692_v17  ;;  %v661_v58 = vld [vmem:[%s1610_s14 + $0x50] sm:$0xff]  ;;  %v664_v60 = vld [vmem:[%s1610_s14 + $0x68] sm:$0xff]  ;;  %v663_v62 = vld [vmem:[%s1610_s14 + $0x60] sm:$0xff] }
 0x138   : > { %1107 = vmatprep.subr.mxu0 %v707_v18  ;;  %1244 = vmatprep.subr.mxu1 %v707_v18  ;;  %v677_v59 = vld [vmem:[%s1610_s14 + $0xd0] sm:$0xff]  ;;  %v680_v61 = vld [vmem:[%s1610_s14 + $0xe8] sm:$0xff]  ;;  %v679_v63 = vld [vmem:[%s1610_s14 + $0xe0] sm:$0xff] }
 0x139   : > { %1108 = vmatpush3.msra.mxu0 %v691_v19  ;;  %1260 = vmatpush3.msra.mxu1 %v691_v19  ;;  %v666_v0 = vld [vmem:[%s1610_s14 + $0x78] sm:$0xff]  ;;  %v665_v2 = vld [vmem:[%s1610_s14 + $0x70] sm:$0xff]  ;;  %v1738_v6 = vld [vmem:[%s1836_s3] ss:$0 sm:$0xff] }
 0x13a   : > { %1109 = vmatprep.subr.mxu0 %v706_v20  ;;  %1245 = vmatprep.subr.mxu1 %v706_v20  ;;  %v682_v1 = vld [vmem:[%s1610_s14 + $0xf8] sm:$0xff]  ;;  %v681_v3 = vld [vmem:[%s1610_s14 + $0xf0] sm:$0xff]  ;;  %s1050_s14 = sshll.u32 %s1459_s18, 4 }
 0x13b   : > { %1110 = vmatpush3.msra.mxu0 %v690_v21  ;;  %1261 = vmatpush3.msra.mxu1 %v690_v21  ;;  %s896_s7 = sadd.s32 %s1051_s6, %s1050_s14 }
 0x13c   : > { %1111 = vmatprep.subr.mxu0 %v705_v22  ;;  %1246 = vmatprep.subr.mxu1 %v705_v22  ;;  %s1052_s18 = sshll.u32 %s896_s7, 7 }
 0x13d   : > { %1112 = vmatpush3.msra.mxu0 %v689_v23  ;;  %1262 = vmatpush3.msra.mxu1 %v689_v23  ;;  %s1774_s30 = scalar_lea.hbm %s1837_s4, %s1052_s18 }
 0x13e   : > { %1113 = vmatprep.subr.mxu0 %v704_v24  ;;  %1247 = vmatprep.subr.mxu1 %v704_v24 }
 0x13f   : > { %1114 = vmatpush3.msra.mxu0 %v688_v25  ;;  %1263 = vmatpush3.msra.mxu1 %v688_v25 }
 0x140   : > { %1115 = vmatprep.subr.mxu0 %v703_v26  ;;  %1248 = vmatprep.subr.mxu1 %v703_v26 }
 0x141   : > { %1116 = vmatpush3.msra.mxu0 %v687_v27  ;;  %1264 = vmatpush3.msra.mxu1 %v687_v27 }
 0x142   : > { %1117 = vmatprep.subr.mxu0 %v702_v28  ;;  %1249 = vmatprep.subr.mxu1 %v702_v28 }
 0x143   : > { %1118 = vmatpush3.msra.mxu0 %v686_v29  ;;  %1265 = vmatpush3.msra.mxu1 %v686_v29 }
 0x144   : > { %1119 = vmatprep.subr.mxu0 %v701_v30  ;;  %1250 = vmatprep.subr.mxu1 %v701_v30 }
 0x145   : > { %1120 = vmatpush3.msra.mxu0 %v685_v31  ;;  %1266 = vmatpush3.msra.mxu1 %v685_v31 }
 0x146   : > { %1121 = vmatprep.subr.mxu0 %v700_v32  ;;  %1251 = vmatprep.subr.mxu1 %v700_v32 }
 0x147   : > { %1122 = vmatpush3.msra.mxu0 %v684_v33  ;;  %1267 = vmatpush3.msra.mxu1 %v684_v33 }
 0x148   : > { %1123 = vmatprep.subr.mxu0 %v699_v34  ;;  %1252 = vmatprep.subr.mxu1 %v699_v34 }
 0x149   : > { %1124 = vmatpush3.msra.mxu0 %v683_v35  ;;  %1268 = vmatpush3.msra.mxu1 %v683_v35 }
 0x14a   : > { %786 = vmatprep.mubr.f32.mxu0 %v652_v36  ;;  %826 = vmatprep.mubr.f32.mxu1 %v668_v37 }
 0x14b   : > { %787 = vmatmul.mubr.f32.vlgmr.msra.gmra.mxu0 %v651_v38  ;;  %827 = vmatmul.mubr.f32.vlgmr.msra.gmra.mxu1 %v667_v39 }
 0x14c   : > { %791 = vmatprep.mubr.f32.mxu0 %v654_v40  ;;  %831 = vmatprep.mubr.f32.mxu1 %v670_v41 }
 0x14f   : > { %792 = vmatmul.mubr.f32.gmra.mxu0 %v653_v42  ;;  %832 = vmatmul.mubr.f32.gmra.mxu1 %v669_v43 }
 0x150   : > { %796 = vmatprep.mubr.f32.mxu0 %v656_v44  ;;  %836 = vmatprep.mubr.f32.mxu1 %v672_v45 }
 0x153   : > { %797 = vmatmul.mubr.f32.gmra.mxu0 %v655_v46  ;;  %837 = vmatmul.mubr.f32.gmra.mxu1 %v671_v47 }
 0x154   : > { %801 = vmatprep.mubr.f32.mxu0 %v658_v48  ;;  %841 = vmatprep.mubr.f32.mxu1 %v674_v49 }
 0x157   : > { %802 = vmatmul.mubr.f32.gmra.mxu0 %v657_v50  ;;  %842 = vmatmul.mubr.f32.gmra.mxu1 %v673_v51 }
 0x158   : > { %806 = vmatprep.mubr.f32.mxu0 %v660_v52  ;;  %846 = vmatprep.mubr.f32.mxu1 %v676_v53 }
 0x15b   : > { %807 = vmatmul.mubr.f32.gmra.mxu0 %v659_v54  ;;  %847 = vmatmul.mubr.f32.gmra.mxu1 %v675_v55 }
 0x15c   : > { %811 = vmatprep.mubr.f32.mxu0 %v662_v56  ;;  %851 = vmatprep.mubr.f32.mxu1 %v678_v57 }
 0x15f   : > { %812 = vmatmul.mubr.f32.gmra.mxu0 %v661_v58  ;;  %852 = vmatmul.mubr.f32.gmra.mxu1 %v677_v59 }
 0x160   : > { %816 = vmatprep.mubr.f32.mxu0 %v664_v60  ;;  %856 = vmatprep.mubr.f32.mxu1 %v680_v61 }
 0x163   : > { %817 = vmatmul.mubr.f32.gmra.mxu0 %v663_v62  ;;  %857 = vmatmul.mubr.f32.gmra.mxu1 %v679_v63 }
 0x164   : > { %821 = vmatprep.mubr.f32.mxu0 %v666_v0  ;;  %861 = vmatprep.mubr.f32.mxu1 %v682_v1 }
 0x167   : > { %822 = vmatmul.mubr.f32.gmra.mxu0 %v665_v2  ;;  %862 = vmatmul.mubr.f32.gmra.mxu1 %v681_v3 }
 0x20b   : > { %v1125_v4 = vpop.f32.mrf.mxu0  ;;  %v1149_v5 = vpop.f32.mrf.mxu1 }
 0x20d   : > { %v1126_v7 = vpop.f32.mrf.mxu0  ;;  %v1150_v8 = vpop.f32.mrf.mxu1 }
 0x20e   : > { %v1127_v9 = vadd.f32 %v1126_v7, %v1125_v4  ;;  %v1151_v10 = vadd.f32 %v1150_v8, %v1149_v5 }
 0x20f   : > { %v1128_v11 = vpop.f32.mrf.mxu0  ;;  %v1152_v12 = vpop.f32.mrf.mxu1 }
 0x210   : > { %v789_v13 = vadd.f32 %v1127_v9, %v1738_v6  ;;  %v829_v14 = vadd.f32 %v1151_v10, %v1738_v6 }
 0x211   : > { %v1129_v15 = vpop.f32.mrf.mxu0  ;;  %v1153_v16 = vpop.f32.mrf.mxu1 }
 0x212   : > { %867 = vst [vmem:[%s1624_s11] sm:$0xff] %v789_v13  ;;  %875 = vst [vmem:[%s1624_s11 + $0x40] sm:$0xff] %v829_v14  ;;  %v1130_v17 = vadd.f32 %v1129_v15, %v1128_v11  ;;  %v1154_v18 = vadd.f32 %v1153_v16, %v1152_v12 }
 0x213   : > { %v1131_v19 = vpop.f32.mrf.mxu0  ;;  %v1155_v20 = vpop.f32.mrf.mxu1 }
 0x214   : > { %v794_v21 = vadd.f32 %v1130_v17, %v1738_v6  ;;  %v834_v22 = vadd.f32 %v1154_v18, %v1738_v6 }
 0x215   : > { %v1132_v23 = vpop.f32.mrf.mxu0  ;;  %v1156_v24 = vpop.f32.mrf.mxu1 }
 0x216   : > { %868 = vst [vmem:[%s1624_s11 + $0x8] sm:$0xff] %v794_v21  ;;  %876 = vst [vmem:[%s1624_s11 + $0x48] sm:$0xff] %v834_v22  ;;  %v1133_v25 = vadd.f32 %v1132_v23, %v1131_v19  ;;  %v1157_v26 = vadd.f32 %v1156_v24, %v1155_v20 }
 0x217   : > { %v1134_v27 = vpop.f32.mrf.mxu0  ;;  %v1158_v28 = vpop.f32.mrf.mxu1 }
 0x218   : > { %v799_v29 = vadd.f32 %v1133_v25, %v1738_v6  ;;  %v839_v30 = vadd.f32 %v1157_v26, %v1738_v6 }
 0x219   : > { %v1135_v31 = vpop.f32.mrf.mxu0  ;;  %v1159_v32 = vpop.f32.mrf.mxu1 }
 0x21a   : > { %869 = vst [vmem:[%s1624_s11 + $0x10] sm:$0xff] %v799_v29  ;;  %877 = vst [vmem:[%s1624_s11 + $0x50] sm:$0xff] %v839_v30  ;;  %v1136_v33 = vadd.f32 %v1135_v31, %v1134_v27  ;;  %v1160_v34 = vadd.f32 %v1159_v32, %v1158_v28 }
 0x21b   : > { %v1137_v35 = vpop.f32.mrf.mxu0  ;;  %v1161_v36 = vpop.f32.mrf.mxu1 }
 0x21c   : > { %v804_v37 = vadd.f32 %v1136_v33, %v1738_v6  ;;  %v844_v38 = vadd.f32 %v1160_v34, %v1738_v6 }
 0x21d   : > { %v1138_v39 = vpop.f32.mrf.mxu0  ;;  %v1162_v40 = vpop.f32.mrf.mxu1 }
 0x21e   : > { %870 = vst [vmem:[%s1624_s11 + $0x18] sm:$0xff] %v804_v37  ;;  %878 = vst [vmem:[%s1624_s11 + $0x58] sm:$0xff] %v844_v38  ;;  %v1139_v41 = vadd.f32 %v1138_v39, %v1137_v35  ;;  %v1163_v42 = vadd.f32 %v1162_v40, %v1161_v36 }
 0x21f   : > { %v1140_v43 = vpop.f32.mrf.mxu0  ;;  %v1164_v44 = vpop.f32.mrf.mxu1 }
 0x220   : > { %v809_v45 = vadd.f32 %v1139_v41, %v1738_v6  ;;  %v849_v46 = vadd.f32 %v1163_v42, %v1738_v6 }
 0x221   : > { %v1141_v47 = vpop.f32.mrf.mxu0  ;;  %v1165_v48 = vpop.f32.mrf.mxu1 }
 0x222   : > { %871 = vst [vmem:[%s1624_s11 + $0x20] sm:$0xff] %v809_v45  ;;  %879 = vst [vmem:[%s1624_s11 + $0x60] sm:$0xff] %v849_v46  ;;  %v1142_v49 = vadd.f32 %v1141_v47, %v1140_v43  ;;  %v1166_v50 = vadd.f32 %v1165_v48, %v1164_v44 }
 0x223   : > { %v1143_v51 = vpop.f32.mrf.mxu0  ;;  %v1167_v52 = vpop.f32.mrf.mxu1 }
 0x224   : > { %v814_v53 = vadd.f32 %v1142_v49, %v1738_v6  ;;  %v854_v54 = vadd.f32 %v1166_v50, %v1738_v6 }
 0x225   : > { %v1144_v55 = vpop.f32.mrf.mxu0  ;;  %v1168_v56 = vpop.f32.mrf.mxu1 }
 0x226   : > { %872 = vst [vmem:[%s1624_s11 + $0x28] sm:$0xff] %v814_v53  ;;  %880 = vst [vmem:[%s1624_s11 + $0x68] sm:$0xff] %v854_v54  ;;  %v1145_v57 = vadd.f32 %v1144_v55, %v1143_v51  ;;  %v1169_v58 = vadd.f32 %v1168_v56, %v1167_v52 }
 0x227   : > { %v1146_v59 = vpop.f32.mrf.mxu0  ;;  %v1170_v60 = vpop.f32.mrf.mxu1 }
 0x228   : > { %v819_v61 = vadd.f32 %v1145_v57, %v1738_v6  ;;  %v859_v62 = vadd.f32 %v1169_v58, %v1738_v6 }
 0x229   : > { %v1147_v63 = vpop.f32.mrf.mxu0  ;;  %v1171_v0 = vpop.f32.mrf.mxu1 }
 0x22a   : > { %873 = vst [vmem:[%s1624_s11 + $0x30] sm:$0xff] %v819_v61  ;;  %881 = vst [vmem:[%s1624_s11 + $0x70] sm:$0xff] %v859_v62  ;;  %v1148_v1 = vadd.f32 %v1147_v63, %v1146_v59  ;;  %v1172_v2 = vadd.f32 %v1171_v0, %v1170_v60 }
 0x22c   : > { %v824_v3 = vadd.f32 %v1148_v1, %v1738_v6  ;;  %v864_v4 = vadd.f32 %v1172_v2, %v1738_v6 }
 0x22e   : > { %874 = vst [vmem:[%s1624_s11 + $0x38] sm:$0xff] %v824_v3  ;;  %882 = vst [vmem:[%s1624_s11 + $0x78] sm:$0xff] %v864_v4 }
 0x22f   : > { %1392 = shalt.err (!%p1389_p10)
}
 0x230   : > { %s1393_s11 = scalar_lea.hbm %s1774_s30, 2048  ;;  %s1397_s28 = scalar_lea.hbm %s1837_s4, 8192 }
 0x231   : > { %p1394_p11 = scmp.ne.s32.totalorder %s1774_s30, %s1393_s11  ;;  %p1398_p0 = scmp.lt.s32.totalorder %s1774_s30, %s1837_s4 }
 0x232   : > { %p1399_p2 = scmp.lt.s32.totalorder %s1397_s28, %s1393_s11 }
 0x233   : > { %p1395_p13 = pnand %p1394_p11, %p1573_p9 }
 0x234   : > { %p1400_p8 = por %p1399_p2, %p1398_p0 }
 0x235   : > { %p1396_p1 = pneg %p1395_p13 }
 0x237   : > { %p1401_p4 = pnand %p1400_p8, %p1396_p1 }
 0x239   : > { %1404 = shalt.err (!%p1401_p4)
}
 0x23a   : > { %s1481_s7 = smov 128   ;;  %s1482_s18 = smov 8  }
 0x23b   : > { %1271 = dma.vmem_to_hbm [thread:$0]  (%p1573_p9), %s1776_s19, 2048, %s1774_s30, %s884_s25, %s1481_s7, %s1481_s7, %s1482_s18  }
 0x23c PF: > { %p1282_p5 = scmp.ge.s32.totalorder %s1475_s22, 2  ;;  %s914_s27 = sand.u32 1, %s1447_s15  }
 0x23d   : > { %s915_s12 = scalar_lea.sflag [#allocation5], %s914_s27 }
 0x23e   : > { %p1278_p3 = pnand %p1282_p5, %p1579_p12 }
 0x240   : > { %p1279_p6 = pneg %p1278_p3 }
 0x242   : > { %1442 = dma.done.wait (%p1279_p6), %s915_s12, 2048  }
 0x243   : > { %1444 = vsyncadd (%p1279_p6), %s915_s12, 4294965248  ;;  %s20_s22 = sadd.s32 1, %s1475_s22   ;;  %s1849_s18 = sld [smem:[#allocation9_spill]] }
 0x244   : > { %p17_p7 = scmp.ge.s32.totalorder %s20_s22, 6   ;;  %s1850_s20 = sld [smem:[#allocation10_spill]] }
 0x245   : > { %s1851_s5 = sld [smem:[#allocation11_spill]]  ;;  %s1852_s15 = smov %s1451_s16 }
 0x246   : > { %s1853_s16 = smov %s1455_s17  ;;  %s1854_s17 = smov %s1586_s10 }
 0x247   : > { %s1855_s19 = smov %s1471_s21  ;;  %19 = sbr.rel (!%p17_p7) target bundleno = 7 (0x7), region = 88 }
 0x24b   : > { %s1856_s21 = smov %s1851_s5 }
 0x24c   :  { %920 = vsyncpa [#allocation4], 1 }
 0x24d   :  { %922 = vsyncpa [#allocation4 + $0x1], 1 }
 0x24e   :  { %923 = vsyncpa [#allocation5], 1 }
 0x24f   :  { %925 = vsyncpa [#allocation5 + $0x1], 1 }

</bundles_post_ra>
